<compile_context>
chip_gen: v6e
topology: v6e:2x2x1
jax: 0.10.0
libtpu: 0.0.40
codegen_flags: <defaults>
</compile_context>

<pallas_src>
import functools

import jax
import jax.numpy as jnp
from jax.experimental import pallas as pl
from jax.experimental.pallas import tpu as pltpu  # noqa: F401  (TPU backend)

_LANE = 128
_BN_EPS = 1e-5


def _round_up(n, m):
    return ((n + m - 1) // m) * m


def _full_spec(shape):
    # Whole-array block: fully VMEM-resident, single grid point.
    return pl.BlockSpec(shape, lambda: (0,) * len(shape))


def _make_fused_kernel(num_hidden):
    """Kernel over refs: x, [w,b,gamma,beta]*num_hidden, w_last, b_last, out."""

    def kernel(*refs):
        x_ref = refs[0]
        idx = 1
        h = x_ref[...]                                   # (B, Din_pad) f32
        for _ in range(num_hidden):
            w_ref, b_ref, g_ref, beta_ref = refs[idx:idx + 4]
            idx += 4
            z = jnp.dot(h, w_ref[...], preferred_element_type=jnp.float32)
            z = z + b_ref[...]
            z = jnp.maximum(z, 0.0)                      # ReLU
            # BatchNorm1d (training mode): batch mean / biased var, f32 stats.
            mean = jnp.mean(z, axis=0, keepdims=True)
            zc = z - mean                                # hoisted centered temp
            var = jnp.mean(zc * zc, axis=0, keepdims=True)
            inv = jax.lax.rsqrt(var + _BN_EPS)
            h = g_ref[...] * zc * inv + beta_ref[...]
        w_ref, b_ref, o_ref = refs[idx], refs[idx + 1], refs[idx + 2]
        out = jnp.dot(h, w_ref[...], preferred_element_type=jnp.float32)
        o_ref[...] = (out + b_ref[...]).astype(o_ref.dtype)

    return kernel


def init_mlp_normed_params(key, input_dim, output_dim, hidden_dims):
    """Deterministic parameter init (PyTorch-style uniform bounds)."""
    params = []
    d_in = input_dim
    dims = list(hidden_dims) + [output_dim]
    for i, d_out in enumerate(dims):
        key, kw, kb = jax.random.split(key, 3)
        bound = 1.0 / jnp.sqrt(jnp.float32(d_in))
        w = jax.random.uniform(kw, (d_out, d_in), jnp.float32, -bound, bound)
        b = jax.random.uniform(kb, (d_out,), jnp.float32, -bound, bound)
        if i < len(hidden_dims):
            gamma = jnp.ones((d_out,), jnp.float32)
            beta = jnp.zeros((d_out,), jnp.float32)
            params.append({"w": w, "b": b, "gamma": gamma, "beta": beta})
        else:
            params.append({"w": w, "b": b})
        d_in = d_out
    return params


def prepare_params(params):
    """One-time (outside jit) pad-to-128-lanes + transpose of all weights.

    Returns (flat_tuple_of_arrays, meta) where meta is a hashable tuple of
    static shape info: (in_dim, in_pad, out_dim, out_pad, num_hidden).
    """
    num_hidden = len(params) - 1
    flat = []
    in_dim = params[0]["w"].shape[1]
    in_pad = _round_up(in_dim, _LANE)
    for i, layer in enumerate(params):
        w = layer["w"]                                   # (Dout, Din)
        d_out, d_in = w.shape
        din_p = _round_up(d_in, _LANE)
        dout_p = _round_up(d_out, _LANE)
        w_t = jnp.zeros((din_p, dout_p), jnp.float32).at[:d_in, :d_out].set(w.T)
        b = jnp.zeros((1, dout_p), jnp.float32).at[:, :d_out].set(layer["b"])
        flat += [w_t, b]
        if i < num_hidden:
            g = jnp.ones((1, dout_p), jnp.float32).at[:, :d_out].set(layer["gamma"])
            be = jnp.zeros((1, dout_p), jnp.float32).at[:, :d_out].set(layer["beta"])
            flat += [g, be]
    out_dim = params[-1]["w"].shape[0]
    out_pad = _round_up(out_dim, _LANE)
    meta = (in_dim, in_pad, out_dim, out_pad, num_hidden)
    return tuple(jax.device_put(a) for a in flat), meta


@functools.partial(jax.jit, static_argnames=("meta",))
def mlp_normed_forward(x, flat_params, meta):
    """x: (B, input_dim) f32 -> (B, output_dim) f32 via one fused Pallas call."""
    in_dim, in_pad, out_dim, out_pad, num_hidden = meta
    B = x.shape[0]
    x_pad = jnp.zeros((B, in_pad), jnp.float32).at[:, :in_dim].set(x)

    operands = (x_pad,) + tuple(flat_params)
    out_padded = pl.pallas_call(
        _make_fused_kernel(num_hidden),
        out_shape=jax.ShapeDtypeStruct((B, out_pad), jnp.float32),
        in_specs=[_full_spec(a.shape) for a in operands],
        out_specs=_full_spec((B, out_pad)),
    )(*operands)
    return out_padded[:, :out_dim]


def mlp_normed_reference(x, params):
    """Pure-JAX reference mirroring PyTorch training-mode forward."""
    h = x
    for layer in params[:-1]:
        h = h @ layer["w"].T + layer["b"]
        h = jnp.maximum(h, 0.0)
        mean = jnp.mean(h, axis=0, keepdims=True)
        var = jnp.mean((h - mean) ** 2, axis=0, keepdims=True)
        h = layer["gamma"] * (h - mean) / jnp.sqrt(var + _BN_EPS) + layer["beta"]
    last = params[-1]
    return h @ last["w"].T + last["b"]


if __name__ == "__main__":
    key = jax.random.PRNGKey(0)
    batch, input_dim, output_dim = 8, 16, 8
    hidden_dims = [32, 32]

    kx, kp = jax.random.split(key)
    x = jax.random.normal(kx, (batch, input_dim), jnp.float32)
    params = init_mlp_normed_params(kp, input_dim, output_dim, hidden_dims)

    # One-time weight padding/transposition OUTSIDE the jitted forward.
    flat_params, meta = prepare_params(params)

    y = mlp_normed_forward(x, flat_params, meta)
    y = jax.block_until_ready(y)

    y_ref = mlp_normed_reference(x, params)
    assert y.shape == (batch, output_dim)
    assert jnp.allclose(y, y_ref, atol=1e-4, rtol=1e-4), "mismatch vs reference"

    print("KERNEL_OK")
</pallas_src>

<mosaic_0001>
module attributes {stable_mosaic.version = 11 : i64} {
  func.func @kernel(%arg0: memref<8x128xf32, #tpu.memory_space<vmem>>, %arg1: memref<128x128xf32, #tpu.memory_space<vmem>>, %arg2: memref<1x128xf32, #tpu.memory_space<vmem>>, %arg3: memref<1x128xf32, #tpu.memory_space<vmem>>, %arg4: memref<1x128xf32, #tpu.memory_space<vmem>>, %arg5: memref<128x128xf32, #tpu.memory_space<vmem>>, %arg6: memref<1x128xf32, #tpu.memory_space<vmem>>, %arg7: memref<1x128xf32, #tpu.memory_space<vmem>>, %arg8: memref<1x128xf32, #tpu.memory_space<vmem>>, %arg9: memref<128x128xf32, #tpu.memory_space<vmem>>, %arg10: memref<1x128xf32, #tpu.memory_space<vmem>>, %arg11: memref<8x128xf32, #tpu.memory_space<vmem>>) attributes {dimension_semantics = [], scalar_prefetch = 0 : i64, scratch_operands = 0 : i64, tpu.core_type = #tpu.core_type<tc>} {
    %c0 = arith.constant 0 : index
    %c0_0 = arith.constant 0 : index
    %0 = vector.load %arg0[%c0, %c0_0] : memref<8x128xf32, #tpu.memory_space<vmem>>, vector<8x128xf32>
    %c0_1 = arith.constant 0 : index
    %c0_2 = arith.constant 0 : index
    %1 = vector.load %arg1[%c0_1, %c0_2] : memref<128x128xf32, #tpu.memory_space<vmem>>, vector<128x128xf32>
    %cst = arith.constant dense<0.000000e+00> : vector<8x128xf32>
    %2 = tpu.matmul %0, %1, %cst {dimension_numbers = #tpu.dot_dimension_numbers<[1], [0], [0], [1], [0, 0, 1, 1], [], []>} : vector<8x128xf32>, vector<128x128xf32>, vector<8x128xf32> -> vector<8x128xf32>
    %c0_3 = arith.constant 0 : index
    %c0_4 = arith.constant 0 : index
    %3 = vector.load %arg2[%c0_3, %c0_4] : memref<1x128xf32, #tpu.memory_space<vmem>>, vector<1x128xf32>
    %4 = vector.broadcast %3 : vector<1x128xf32> to vector<8x128xf32>
    %5 = arith.addf %2, %4 : vector<8x128xf32>
    %cst_5 = arith.constant 0.000000e+00 : f32
    %6 = vector.broadcast %cst_5 : f32 to vector<8x128xf32>
    %7 = arith.maximumf %5, %6 : vector<8x128xf32>
    %cst_6 = arith.constant dense<0.000000e+00> : vector<128xf32>
    %8 = vector.multi_reduction <add>, %7, %cst_6 [0] : vector<8x128xf32> to vector<128xf32>
    %9 = vector.shape_cast %8 : vector<128xf32> to vector<1x128xf32>
    %cst_7 = arith.constant 8.000000e+00 : f32
    %10 = vector.broadcast %cst_7 : f32 to vector<1x128xf32>
    %11 = arith.divf %9, %10 : vector<1x128xf32>
    %12 = vector.broadcast %11 : vector<1x128xf32> to vector<8x128xf32>
    %13 = arith.subf %7, %12 : vector<8x128xf32>
    %14 = arith.mulf %13, %13 : vector<8x128xf32>
    %cst_8 = arith.constant dense<0.000000e+00> : vector<128xf32>
    %15 = vector.multi_reduction <add>, %14, %cst_8 [0] : vector<8x128xf32> to vector<128xf32>
    %16 = vector.shape_cast %15 : vector<128xf32> to vector<1x128xf32>
    %cst_9 = arith.constant 8.000000e+00 : f32
    %17 = vector.broadcast %cst_9 : f32 to vector<1x128xf32>
    %18 = arith.divf %16, %17 : vector<1x128xf32>
    %cst_10 = arith.constant 9.99999974E-6 : f32
    %19 = vector.broadcast %cst_10 : f32 to vector<1x128xf32>
    %20 = arith.addf %18, %19 : vector<1x128xf32>
    %21 = math.rsqrt %20 : vector<1x128xf32>
    %c0_11 = arith.constant 0 : index
    %c0_12 = arith.constant 0 : index
    %22 = vector.load %arg3[%c0_11, %c0_12] : memref<1x128xf32, #tpu.memory_space<vmem>>, vector<1x128xf32>
    %23 = vector.broadcast %22 : vector<1x128xf32> to vector<8x128xf32>
    %24 = arith.mulf %23, %13 : vector<8x128xf32>
    %25 = vector.broadcast %21 : vector<1x128xf32> to vector<8x128xf32>
    %26 = arith.mulf %24, %25 : vector<8x128xf32>
    %c0_13 = arith.constant 0 : index
    %c0_14 = arith.constant 0 : index
    %27 = vector.load %arg4[%c0_13, %c0_14] : memref<1x128xf32, #tpu.memory_space<vmem>>, vector<1x128xf32>
    %28 = vector.broadcast %27 : vector<1x128xf32> to vector<8x128xf32>
    %29 = arith.addf %26, %28 : vector<8x128xf32>
    %c0_15 = arith.constant 0 : index
    %c0_16 = arith.constant 0 : index
    %30 = vector.load %arg5[%c0_15, %c0_16] : memref<128x128xf32, #tpu.memory_space<vmem>>, vector<128x128xf32>
    %cst_17 = arith.constant dense<0.000000e+00> : vector<8x128xf32>
    %31 = tpu.matmul %29, %30, %cst_17 {dimension_numbers = #tpu.dot_dimension_numbers<[1], [0], [0], [1], [0, 0, 1, 1], [], []>} : vector<8x128xf32>, vector<128x128xf32>, vector<8x128xf32> -> vector<8x128xf32>
    %c0_18 = arith.constant 0 : index
    %c0_19 = arith.constant 0 : index
    %32 = vector.load %arg6[%c0_18, %c0_19] : memref<1x128xf32, #tpu.memory_space<vmem>>, vector<1x128xf32>
    %33 = vector.broadcast %32 : vector<1x128xf32> to vector<8x128xf32>
    %34 = arith.addf %31, %33 : vector<8x128xf32>
    %cst_20 = arith.constant 0.000000e+00 : f32
    %35 = vector.broadcast %cst_20 : f32 to vector<8x128xf32>
    %36 = arith.maximumf %34, %35 : vector<8x128xf32>
    %cst_21 = arith.constant dense<0.000000e+00> : vector<128xf32>
    %37 = vector.multi_reduction <add>, %36, %cst_21 [0] : vector<8x128xf32> to vector<128xf32>
    %38 = vector.shape_cast %37 : vector<128xf32> to vector<1x128xf32>
    %cst_22 = arith.constant 8.000000e+00 : f32
    %39 = vector.broadcast %cst_22 : f32 to vector<1x128xf32>
    %40 = arith.divf %38, %39 : vector<1x128xf32>
    %41 = vector.broadcast %40 : vector<1x128xf32> to vector<8x128xf32>
    %42 = arith.subf %36, %41 : vector<8x128xf32>
    %43 = arith.mulf %42, %42 : vector<8x128xf32>
    %cst_23 = arith.constant dense<0.000000e+00> : vector<128xf32>
    %44 = vector.multi_reduction <add>, %43, %cst_23 [0] : vector<8x128xf32> to vector<128xf32>
    %45 = vector.shape_cast %44 : vector<128xf32> to vector<1x128xf32>
    %cst_24 = arith.constant 8.000000e+00 : f32
    %46 = vector.broadcast %cst_24 : f32 to vector<1x128xf32>
    %47 = arith.divf %45, %46 : vector<1x128xf32>
    %cst_25 = arith.constant 9.99999974E-6 : f32
    %48 = vector.broadcast %cst_25 : f32 to vector<1x128xf32>
    %49 = arith.addf %47, %48 : vector<1x128xf32>
    %50 = math.rsqrt %49 : vector<1x128xf32>
    %c0_26 = arith.constant 0 : index
    %c0_27 = arith.constant 0 : index
    %51 = vector.load %arg7[%c0_26, %c0_27] : memref<1x128xf32, #tpu.memory_space<vmem>>, vector<1x128xf32>
    %52 = vector.broadcast %51 : vector<1x128xf32> to vector<8x128xf32>
    %53 = arith.mulf %52, %42 : vector<8x128xf32>
    %54 = vector.broadcast %50 : vector<1x128xf32> to vector<8x128xf32>
    %55 = arith.mulf %53, %54 : vector<8x128xf32>
    %c0_28 = arith.constant 0 : index
    %c0_29 = arith.constant 0 : index
    %56 = vector.load %arg8[%c0_28, %c0_29] : memref<1x128xf32, #tpu.memory_space<vmem>>, vector<1x128xf32>
    %57 = vector.broadcast %56 : vector<1x128xf32> to vector<8x128xf32>
    %58 = arith.addf %55, %57 : vector<8x128xf32>
    %c0_30 = arith.constant 0 : index
    %c0_31 = arith.constant 0 : index
    %59 = vector.load %arg9[%c0_30, %c0_31] : memref<128x128xf32, #tpu.memory_space<vmem>>, vector<128x128xf32>
    %cst_32 = arith.constant dense<0.000000e+00> : vector<8x128xf32>
    %60 = tpu.matmul %58, %59, %cst_32 {dimension_numbers = #tpu.dot_dimension_numbers<[1], [0], [0], [1], [0, 0, 1, 1], [], []>} : vector<8x128xf32>, vector<128x128xf32>, vector<8x128xf32> -> vector<8x128xf32>
    %c0_33 = arith.constant 0 : index
    %c0_34 = arith.constant 0 : index
    %61 = vector.load %arg10[%c0_33, %c0_34] : memref<1x128xf32, #tpu.memory_space<vmem>>, vector<1x128xf32>
    %62 = vector.broadcast %61 : vector<1x128xf32> to vector<8x128xf32>
    %63 = arith.addf %60, %62 : vector<8x128xf32>
    %c0_35 = arith.constant 0 : index
    %c0_36 = arith.constant 0 : index
    %64 = vector.load %arg11[%c0_35, %c0_36] : memref<8x128xf32, #tpu.memory_space<vmem>>, vector<8x128xf32>
    tpu.vector_store %arg11[%c0_35, %c0_36], %63 {strides = array<i32>} : memref<8x128xf32, #tpu.memory_space<vmem>>, vector<8x128xf32>,
    return
  }
}

</mosaic_0001>

<bundles_post_ra>
// kernel: mlp_normed_forward.1
= control target key start
LH: loop header
LB: loop body
LE: loop exit
PB: predicated region body
PF: predicated region fallthrough
CT: control target
= control target key end

     0   :  { %16 = vsyncpa [#allocation3], 0  ;;  %s869_s0 = inlined_call_operand.vmem [shape: f32[8,128], index: 0, kind: input, shape index: {}]   ;;  %s870_s1 = inlined_call_operand.hbm [shape: f32[128,128], index: 1, kind: input, shape index: {}]   ;;  %s871_s2 = inlined_call_operand.vmem [shape: f32[1,128], index: 2, kind: input, shape index: {}]   ;;  %s872_s3 = inlined_call_operand.vmem [shape: f32[1,128], index: 3, kind: input, shape index: {}]   ;;  %s873_s4 = inlined_call_operand.vmem [shape: f32[1,128], index: 4, kind: input, shape index: {}]   ;;  %s874_s5 = inlined_call_operand.hbm [shape: f32[128,128], index: 5, kind: input, shape index: {}]   ;;  %s875_s6 = inlined_call_operand.vmem [shape: f32[1,128], index: 6, kind: input, shape index: {}]   ;;  %s876_s7 = inlined_call_operand.vmem [shape: f32[1,128], index: 7, kind: input, shape index: {}]   ;;  %s877_s8 = inlined_call_operand.vmem [shape: f32[1,128], index: 8, kind: input, shape index: {}]   ;;  %s878_s9 = inlined_call_operand.hbm [shape: f32[128,128], index: 9, kind: input, shape index: {}]   ;;  %s879_s10 = inlined_call_operand.vmem [shape: f32[1,128], index: 10, kind: input, shape index: {}]   ;;  %s880_s11 = inlined_call_operand.hbm [shape: f32[8,128], index: 11, kind: output, shape index: {}]  }
   0x1   :  { %17 = vsyncpa [#allocation6], 0 }
   0x2   :  { %18 = vsyncpa [#allocation4], 0  ;;  %s711_s17 = smov [#allocation5]   ;;  %s712_s19 = smov [#allocation2]  }
   0x3   :  { %s44_s18 = sshll.u32 %s711_s17, 4  ;;  %s26_s20 = sshll.u32 %s712_s19, 4  ;;  %s45_s18 = int_to_ptr.vmem [resolvable:$true] %s44_s18  ;;  %s27_s20 = int_to_ptr.vmem [resolvable:$true] %s26_s20 }
   0x4   :  { %s633_s21 = scalar_lea.vmem %s45_s18, 2048  ;;  %p638_p1 = scmp.lt.s32.totalorder %s45_s18, %s45_s18 }
   0x5   :  { %p634_p0 = scmp.ne.s32.totalorder %s45_s18, %s633_s21  ;;  %p639_p2 = scmp.lt.s32.totalorder %s633_s21, %s633_s21 }
   0x7   :  { %p640_p3 = por %p639_p2, %p638_p1 }
   0x9   :  { %p641_p4 = pnand %p640_p3, %p634_p0 }
   0xb   :  { %644 = shalt.err (!%p641_p4)
}
   0xc   :  { %s713_s22 = smov 128   ;;  %s714_s23 = smov 8  }
   0xd   :  { %50 = dma.hbm_to_vmem [thread:$0]  %s874_s5, 2048, %s45_s18, [#allocation6], %s713_s22, %s713_s22, %s714_s23  }
   0xe   :  { %s653_s26 = scalar_lea.vmem %s27_s20, 2048  ;;  %p658_p6 = scmp.lt.s32.totalorder %s27_s20, %s27_s20 }
   0xf   :  { %p654_p5 = scmp.ne.s32.totalorder %s27_s20, %s653_s26  ;;  %p659_p7 = scmp.lt.s32.totalorder %s653_s26, %s653_s26 }
  0x11   :  { %p660_p8 = por %p659_p7, %p658_p6 }
  0x13   :  { %p661_p9 = pnand %p660_p8, %p654_p5 }
  0x15   :  { %664 = shalt.err (!%p661_p9)
}
  0x16   :  { %32 = dma.hbm_to_vmem [thread:$0]  %s870_s1, 2048, %s27_s20, [#allocation3], %s713_s22, %s713_s22, %s714_s23  }
  0x17   :  { %s715_s29 = smov [#allocation7]  }
  0x18   :  { %s62_s30 = sshll.u32 %s715_s29, 4  ;;  %s63_s30 = int_to_ptr.vmem [resolvable:$true] %s62_s30 }
  0x19   :  { %s673_s12 = scalar_lea.vmem %s63_s30, 2048  ;;  %p678_p11 = scmp.lt.s32.totalorder %s63_s30, %s63_s30 }
  0x1a   :  { %p674_p10 = scmp.ne.s32.totalorder %s63_s30, %s673_s12  ;;  %p679_p12 = scmp.lt.s32.totalorder %s673_s12, %s673_s12 }
  0x1c   :  { %p680_p13 = por %p679_p12, %p678_p11 }
  0x1e   :  { %p681_p0 = pnand %p680_p13, %p674_p10 }
  0x20   :  { %684 = shalt.err (!%p681_p0)
}
  0x21   :  { %68 = dma.hbm_to_vmem [thread:$0]  %s878_s9, 2048, %s63_s30, [#allocation6], %s713_s22, %s713_s22, %s714_s23  }
  0x22   :  { %705 = dma.done.wait [#allocation3], 2048  }
  0x23   :  { %706 = vsyncadd [#allocation3], 4294965248 }
  0x24   :  { %707 = dma.done.wait [#allocation6], 4096  }
  0x25   :  { %708 = vsyncadd [#allocation6], 4294963200  ;;  %v716_v0 = vmov 0.0   ;;  %vm717_vm0 = vmmov 0   ;;  %v96_v1 = vld [vmem:[#allocation2 + $0x78] sm:$0xff]  ;;  %v95_v2 = vld [vmem:[#allocation2 + $0x70] sm:$0xff] }
  0x26   :  { %508 = vmatprep.subr.mxu0 %v716_v0  ;;  %540 = vmatprep.mubr.msk.f32.mxu0 %vm717_vm0, %v716_v0  ;;  %v94_v3 = vld [vmem:[#allocation2 + $0x68] sm:$0xff]  ;;  %v93_v4 = vld [vmem:[#allocation2 + $0x60] sm:$0xff]  ;;  %v92_v5 = vld [vmem:[#allocation2 + $0x58] sm:$0xff]  ;;  %s718_s23 = smov [#allocation8]  }
  0x27   :  { %543 = vmatprep.subr.mxu1 %v716_v0  ;;  %575 = vmatprep.mubr.msk.f32.mxu1 %vm717_vm0, %v716_v0  ;;  %v91_v6 = vld [vmem:[#allocation2 + $0x50] sm:$0xff]  ;;  %v90_v7 = vld [vmem:[#allocation2 + $0x48] sm:$0xff]  ;;  %v89_v8 = vld [vmem:[#allocation2 + $0x40] sm:$0xff]  ;;  %s440_s24 = sshll.u32 %s718_s23, 4  ;;  %s441_s24 = int_to_ptr.vmem [resolvable:$true] %s440_s24 }
  0x28   :  { %509 = vmatpush3.msra.mxu0 %v96_v1  ;;  %v88_v9 = vld [vmem:[#allocation2 + $0x38] sm:$0xff]  ;;  %v87_v10 = vld [vmem:[#allocation2 + $0x30] sm:$0xff]  ;;  %v86_v11 = vld [vmem:[#allocation2 + $0x28] sm:$0xff]  ;;  %p690_p2 = scmp.lt.s32.totalorder %s441_s24, %s441_s24 }
  0x29   :  { %510 = vmatprep.subr.mxu0 %v716_v0  ;;  %v85_v12 = vld [vmem:[#allocation2 + $0x20] sm:$0xff]  ;;  %v84_v13 = vld [vmem:[#allocation2 + $0x18] sm:$0xff]  ;;  %v83_v14 = vld [vmem:[#allocation2 + $0x10] sm:$0xff] }
  0x2a   :  { %511 = vmatpush3.msra.mxu0 %v95_v2  ;;  %v82_v15 = vld [vmem:[#allocation2 + $0x8] sm:$0xff]  ;;  %v81_v16 = vld [vmem:[#allocation2] sm:$0xff]  ;;  %v226_v18 = vld [vmem:[#allocation5 + $0x78] sm:$0xff] }
  0x2b   :  { %512 = vmatprep.subr.mxu0 %v716_v0  ;;  %v80_v17 = vld [vmem:[%s869_s0] sm:$0xff]  ;;  %544 = vmatpush3.msra.mxu1 %v226_v18  ;;  %v225_v19 = vld [vmem:[#allocation5 + $0x70] sm:$0xff]  ;;  %v224_v20 = vld [vmem:[#allocation5 + $0x68] sm:$0xff] }
  0x2c   :  { %513 = vmatpush3.msra.mxu0 %v94_v3  ;;  %545 = vmatprep.subr.mxu1 %v716_v0  ;;  %v223_v21 = vld [vmem:[#allocation5 + $0x60] sm:$0xff]  ;;  %v222_v22 = vld [vmem:[#allocation5 + $0x58] sm:$0xff]  ;;  %v221_v23 = vld [vmem:[#allocation5 + $0x50] sm:$0xff] }
  0x2d   :  { %514 = vmatprep.subr.mxu0 %v716_v0  ;;  %546 = vmatpush3.msra.mxu1 %v225_v19  ;;  %v220_v24 = vld [vmem:[#allocation5 + $0x48] sm:$0xff]  ;;  %v219_v25 = vld [vmem:[#allocation5 + $0x40] sm:$0xff]  ;;  %v218_v26 = vld [vmem:[#allocation5 + $0x38] sm:$0xff] }
  0x2e   :  { %515 = vmatpush3.msra.mxu0 %v93_v4  ;;  %547 = vmatprep.subr.mxu1 %v716_v0  ;;  %v217_v27 = vld [vmem:[#allocation5 + $0x30] sm:$0xff]  ;;  %v216_v28 = vld [vmem:[#allocation5 + $0x28] sm:$0xff]  ;;  %v215_v29 = vld [vmem:[#allocation5 + $0x20] sm:$0xff] }
  0x2f   :  { %516 = vmatprep.subr.mxu0 %v716_v0  ;;  %548 = vmatpush3.msra.mxu1 %v224_v20  ;;  %v214_v30 = vld [vmem:[#allocation5 + $0x18] sm:$0xff]  ;;  %v213_v31 = vld [vmem:[#allocation5 + $0x10] sm:$0xff]  ;;  %v212_v32 = vld [vmem:[#allocation5 + $0x8] sm:$0xff] }
  0x30   :  { %517 = vmatpush3.msra.mxu0 %v92_v5  ;;  %549 = vmatprep.subr.mxu1 %v716_v0  ;;  %v211_v33 = vld [vmem:[#allocation5] sm:$0xff]  ;;  %v355_v62 = vld [vmem:[#allocation7 + $0x78] sm:$0xff]  ;;  %v354_v63 = vld [vmem:[#allocation7 + $0x70] sm:$0xff] }
  0x31   :  { %518 = vmatprep.subr.mxu0 %v716_v0  ;;  %550 = vmatpush3.msra.mxu1 %v223_v21  ;;  %v450_v34 = vld [vmem:[%s871_s2] ss:$0 sm:$0xff]  ;;  %v353_v1 = vld [vmem:[#allocation7 + $0x68] sm:$0xff]  ;;  %v351_v3 = vld [vmem:[#allocation7 + $0x58] sm:$0xff] }
  0x32   :  { %519 = vmatpush3.msra.mxu0 %v91_v6  ;;  %551 = vmatprep.subr.mxu1 %v716_v0  ;;  %v451_v56 = vld [vmem:[%s872_s3] ss:$0 sm:$0xff]  ;;  %v350_v4 = vld [vmem:[#allocation7 + $0x50] sm:$0xff]  ;;  %v349_v5 = vld [vmem:[#allocation7 + $0x48] sm:$0xff] }
  0x33   :  { %520 = vmatprep.subr.mxu0 %v716_v0  ;;  %552 = vmatpush3.msra.mxu1 %v222_v22  ;;  %v452_v59 = vld [vmem:[%s873_s4] ss:$0 sm:$0xff] }
  0x34   :  { %521 = vmatpush3.msra.mxu0 %v90_v7  ;;  %553 = vmatprep.subr.mxu1 %v716_v0  ;;  %v352_v2 = vld [vmem:[#allocation7 + $0x60] sm:$0xff]  ;;  %v347_v7 = vld [vmem:[#allocation7 + $0x38] sm:$0xff] }
  0x35   :  { %522 = vmatprep.subr.mxu0 %v716_v0  ;;  %554 = vmatpush3.msra.mxu1 %v221_v23  ;;  %v348_v6 = vld [vmem:[#allocation7 + $0x40] sm:$0xff] }
  0x36   :  { %523 = vmatpush3.msra.mxu0 %v89_v8  ;;  %555 = vmatprep.subr.mxu1 %v716_v0  ;;  %v346_v8 = vld [vmem:[#allocation7 + $0x30] sm:$0xff] }
  0x37   :  { %524 = vmatprep.subr.mxu0 %v716_v0  ;;  %556 = vmatpush3.msra.mxu1 %v220_v24 }
  0x38   :  { %525 = vmatpush3.msra.mxu0 %v88_v9  ;;  %557 = vmatprep.subr.mxu1 %v716_v0  ;;  %v345_v9 = vld [vmem:[#allocation7 + $0x28] sm:$0xff] }
  0x39   :  { %526 = vmatprep.subr.mxu0 %v716_v0  ;;  %558 = vmatpush3.msra.mxu1 %v219_v25 }
  0x3a   :  { %527 = vmatpush3.msra.mxu0 %v87_v10  ;;  %559 = vmatprep.subr.mxu1 %v716_v0  ;;  %v344_v10 = vld [vmem:[#allocation7 + $0x20] sm:$0xff] }
  0x3b   :  { %528 = vmatprep.subr.mxu0 %v716_v0  ;;  %560 = vmatpush3.msra.mxu1 %v218_v26 }
  0x3c   :  { %529 = vmatpush3.msra.mxu0 %v86_v11  ;;  %561 = vmatprep.subr.mxu1 %v716_v0  ;;  %v343_v11 = vld [vmem:[#allocation7 + $0x18] sm:$0xff] }
  0x3d   :  { %530 = vmatprep.subr.mxu0 %v716_v0  ;;  %562 = vmatpush3.msra.mxu1 %v217_v27 }
  0x3e   :  { %531 = vmatpush3.msra.mxu0 %v85_v12  ;;  %563 = vmatprep.subr.mxu1 %v716_v0  ;;  %v342_v12 = vld [vmem:[#allocation7 + $0x10] sm:$0xff] }
  0x3f   :  { %532 = vmatprep.subr.mxu0 %v716_v0  ;;  %564 = vmatpush3.msra.mxu1 %v216_v28 }
  0x40   :  { %533 = vmatpush3.msra.mxu0 %v84_v13  ;;  %565 = vmatprep.subr.mxu1 %v716_v0  ;;  %v341_v13 = vld [vmem:[#allocation7 + $0x8] sm:$0xff] }
  0x41   :  { %534 = vmatprep.subr.mxu0 %v716_v0  ;;  %566 = vmatpush3.msra.mxu1 %v215_v29 }
  0x42   :  { %535 = vmatpush3.msra.mxu0 %v83_v14  ;;  %567 = vmatprep.subr.mxu1 %v716_v0  ;;  %v340_v14 = vld [vmem:[#allocation7] sm:$0xff] }
  0x43   :  { %536 = vmatprep.subr.mxu0 %v716_v0  ;;  %568 = vmatpush3.msra.mxu1 %v214_v30 }
  0x44   :  { %537 = vmatpush3.msra.mxu0 %v82_v15  ;;  %569 = vmatprep.subr.mxu1 %v716_v0  ;;  %v453_v15 = vld [vmem:[%s875_s6] ss:$0 sm:$0xff] }
  0x45   :  { %538 = vmatprep.subr.mxu0 %v716_v0  ;;  %570 = vmatpush3.msra.mxu1 %v213_v31 }
  0x46   :  { %539 = vmatpush3.msra.mxu0 %v81_v16  ;;  %571 = vmatprep.subr.mxu1 %v716_v0 }
  0x47   :  { %541 = vmatmul.mubr.f32.vlgmr.msra.gmra.mxu0 %v80_v17  ;;  %578 = vmatprep.subr.mxu0 %v716_v0 }
  0x48   :  { %610 = vmatprep.mubr.msk.f32.mxu0 %vm717_vm0, %v716_v0  ;;  %572 = vmatpush3.msra.mxu1 %v212_v32 }
  0x49   :  { %573 = vmatprep.subr.mxu1 %v716_v0  ;;  %579 = vmatpush3.msra.mxu0 %v355_v62 }
  0x4a   :  { %574 = vmatpush3.msra.mxu1 %v211_v33  ;;  %580 = vmatprep.subr.mxu0 %v716_v0 }
  0x4b   :  { %581 = vmatpush3.msra.mxu0 %v354_v63 }
  0x4c   :  { %582 = vmatprep.subr.mxu0 %v716_v0 }
  0x4d   :  { %583 = vmatpush3.msra.mxu0 %v353_v1 }
  0x4e   :  { %584 = vmatprep.subr.mxu0 %v716_v0 }
  0x4f   :  { %585 = vmatpush3.msra.mxu0 %v352_v2 }
  0x50   :  { %586 = vmatprep.subr.mxu0 %v716_v0 }
  0x51   :  { %587 = vmatpush3.msra.mxu0 %v351_v3 }
  0x52   :  { %588 = vmatprep.subr.mxu0 %v716_v0 }
  0x53   :  { %589 = vmatpush3.msra.mxu0 %v350_v4 }
  0x54   :  { %590 = vmatprep.subr.mxu0 %v716_v0 }
  0x55   :  { %591 = vmatpush3.msra.mxu0 %v349_v5 }
  0x56   :  { %592 = vmatprep.subr.mxu0 %v716_v0 }
  0x57   :  { %593 = vmatpush3.msra.mxu0 %v348_v6 }
  0x58   :  { %594 = vmatprep.subr.mxu0 %v716_v0 }
  0x59   :  { %595 = vmatpush3.msra.mxu0 %v347_v7 }
  0x5a   :  { %596 = vmatprep.subr.mxu0 %v716_v0 }
  0x5b   :  { %597 = vmatpush3.msra.mxu0 %v346_v8 }
  0x5c   :  { %598 = vmatprep.subr.mxu0 %v716_v0 }
  0x5d   :  { %599 = vmatpush3.msra.mxu0 %v345_v9 }
  0x5e   :  { %600 = vmatprep.subr.mxu0 %v716_v0 }
  0x5f   :  { %601 = vmatpush3.msra.mxu0 %v344_v10 }
  0x60   :  { %602 = vmatprep.subr.mxu0 %v716_v0 }
  0x61   :  { %603 = vmatpush3.msra.mxu0 %v343_v11 }
  0x62   :  { %604 = vmatprep.subr.mxu0 %v716_v0 }
  0x63   :  { %605 = vmatpush3.msra.mxu0 %v342_v12 }
  0x64   :  { %606 = vmatprep.subr.mxu0 %v716_v0 }
  0x65   :  { %607 = vmatpush3.msra.mxu0 %v341_v13 }
  0x66   :  { %608 = vmatprep.subr.mxu0 %v716_v0 }
  0x67   :  { %609 = vmatpush3.msra.mxu0 %v340_v14 }
 0x107   :  { %v170_v35 = vpop.f32.mrf.mxu0 }
 0x108   :  { %v171_v36 = vadd.f32 %v450_v34, %v170_v35 }
 0x109   :  { %v542_v37 = vpop.f32.mrf.mxu0 }
 0x10a   :  { %v174_v38 = vmax.f32 %v171_v36, 0.0  ;;  %v454_v36 = vld [vmem:[%s876_s7] ss:$0 sm:$0xff]  ;;  %s685_s7 = scalar_lea.vmem %s441_s24, 128 }
 0x10b   :  { %p686_p1 = scmp.ne.s32.totalorder %s441_s24, %s685_s7  ;;  %p691_p3 = scmp.lt.s32.totalorder %s685_s7, %s685_s7 }
 0x10c   :  { %v175_v39 = vrot.slane %v174_v38, 4 }
 0x10d   :  { %p692_p4 = por %p691_p3, %p690_p2 }
 0x10e   :  { %v176_v40 = vadd.f32 %v175_v39, %v174_v38  ;;  %v455_v39 = vld [vmem:[%s877_s8] ss:$0 sm:$0xff] }
 0x10f   :  { %p693_p5 = pnand %p692_p4, %p686_p1 }
 0x110   :  { %v177_v41 = vrot.slane %v176_v40, 2 }
 0x112   :  { %v178_v42 = vadd.f32 %v177_v41, %v176_v40 }
 0x114   :  { %v179_v43 = vrot.slane %v178_v42, 1 }
 0x116   :  { %v180_v44 = vadd.f32 %v179_v43, %v178_v42  ;;  %v456_v42 = vld [vmem:[%s879_s10] ss:$0 sm:$0xff] }
 0x118   :  { %v182_v45 = vmul.f32 0.125, %v180_v44 }
 0x11a   :  { %v183_v46 = vsub.f32 %v174_v38, %v182_v45 }
 0x11c   :  { %v184_v47 = vmul.f32 %v183_v46, %v183_v46  ;;  %v201_v57 = vmul.f32 %v451_v56, %v183_v46 }
 0x11e   :  { %v185_v48 = vrot.slane %v184_v47, 4 }
 0x120   :  { %v186_v49 = vadd.f32 %v185_v48, %v184_v47 }
 0x122   :  { %v187_v50 = vrot.slane %v186_v49, 2 }
 0x124   :  { %v188_v51 = vadd.f32 %v187_v50, %v186_v49 }
 0x126   :  { %v189_v52 = vrot.slane %v188_v51, 1 }
 0x128   :  { %v190_v53 = vadd.f32 %v189_v52, %v188_v51 }
 0x12a   :  { %v191_v54 = vmul.f32 0.125, %v190_v53 }
 0x12c   :  { %v192_v55 = vadd.f32 1e-05, %v191_v54 }
 0x12e   :  { %621 = vrsqrt.f32 %v192_v55 }
 0x13b   :  { %v622_v58 = vpop.eup %621 }
 0x13c   :  { %v202_v60 = vmul.f32 %v622_v58, %v201_v57 }
 0x13e   :  { %v210_v61 = vadd.f32 %v452_v59, %v202_v60 }
 0x140   :  { %576 = vmatmul.mubr.f32.vlgmr.msra.gmra.mxu1 %v210_v61 }
 0x200   :  { %v300_v16 = vpop.f32.mrf.mxu1 }
 0x201   :  { %v301_v17 = vadd.f32 %v453_v15, %v300_v16 }
 0x202   :  { %v577_v18 = vpop.f32.mrf.mxu1 }
 0x203   :  { %v304_v19 = vmax.f32 %v301_v17, 0.0 }
 0x205   :  { %v305_v20 = vrot.slane %v304_v19, 4 }
 0x207   :  { %v306_v21 = vadd.f32 %v305_v20, %v304_v19 }
 0x209   :  { %v307_v22 = vrot.slane %v306_v21, 2 }
 0x20b   :  { %v308_v23 = vadd.f32 %v307_v22, %v306_v21 }
 0x20d   :  { %v309_v24 = vrot.slane %v308_v23, 1 }
 0x20f   :  { %v310_v25 = vadd.f32 %v309_v24, %v308_v23 }
 0x211   :  { %v311_v26 = vmul.f32 0.125, %v310_v25 }
 0x213   :  { %v312_v27 = vsub.f32 %v304_v19, %v311_v26 }
 0x215   :  { %v313_v28 = vmul.f32 %v312_v27, %v312_v27  ;;  %v330_v37 = vmul.f32 %v454_v36, %v312_v27 }
 0x217   :  { %v314_v29 = vrot.slane %v313_v28, 4 }
 0x219   :  { %v315_v0 = vadd.f32 %v314_v29, %v313_v28 }
 0x21b   :  { %v316_v30 = vrot.slane %v315_v0, 2 }
 0x21d   :  { %v317_v31 = vadd.f32 %v316_v30, %v315_v0 }
 0x21f   :  { %v318_v32 = vrot.slane %v317_v31, 1 }
 0x221   :  { %v319_v33 = vadd.f32 %v318_v32, %v317_v31 }
 0x223   :  { %v320_v34 = vmul.f32 0.125, %v319_v33 }
 0x225   :  { %v321_v35 = vadd.f32 1e-05, %v320_v34 }
 0x227   :  { %623 = vrsqrt.f32 %v321_v35 }
 0x234   :  { %v624_v38 = vpop.eup %623 }
 0x235   :  { %v331_v40 = vmul.f32 %v624_v38, %v330_v37 }
 0x237   :  { %v339_v41 = vadd.f32 %v455_v39, %v331_v40 }
 0x239   :  { %611 = vmatmul.mubr.f32.vlgmr.msra.gmra.mxu0 %v339_v41 }
 0x2f9   :  { %v429_v43 = vpop.f32.mrf.mxu0 }
 0x2fa   :  { %v430_v44 = vadd.f32 %v456_v42, %v429_v43 }
 0x2fb   :  { %v612_v45 = vpop.f32.mrf.mxu0 }
 0x2fc   :  { %433 = vst [vmem:[#allocation8] sm:$0xff] %v430_v44 }
 0x2fd   :  { %696 = shalt.err (!%p693_p5)
}
 0x2fe   :  { %443 = dma.vmem_to_hbm [thread:$0]  %s441_s24, 128, %s880_s11, [#allocation4]  }
 0x2ff   :  { %709 = dma.done.wait [#allocation4], 128  }
 0x300   :  { %710 = vsyncadd [#allocation4], 4294967168 }
 0x301   :  { %447 = vsyncpa [#allocation3], 1 }
 0x302   :  { %448 = vsyncpa [#allocation6], 1 }
 0x303   :  { %449 = vsyncpa [#allocation4], 1 }

</bundles_post_ra>
